<compile_context>
chip_gen: v7x
topology: tpu7x:2x2x1
jax: 0.10.0
libtpu: 0.0.40
codegen_flags: <defaults>
</compile_context>

<pallas_src>
import jax
import jax.numpy as jnp
from jax.experimental import pallas as pl
from jax.experimental.pallas import tpu as pltpu


def _make_conv_add_kernel(H, W, OH, OW, KH, KW):
    """Fused valid/stride-1 conv (+bias via ones-row) + elementwise add."""
    # Flat-index span that covers every valid output position p = oh*W + ow.
    span = (OH - 1) * W + OW

    def kernel(x_ref, w_ref, other_ref, o_ref):
        # x_ref     : (Cin+1, H*W)         input, spatial flattened, + ones row
        # w_ref     : (KH*KW, Cout, Cin+1) tap-major weight; bias folded in tap 0
        # other_ref : (Cout, OH*OW)        tensor added after the conv
        # o_ref     : (Cout, OH*OW)        output (aliases `other`'s HBM buffer)

        # Conv over the flat spatial index:
        #   acc[:, p] = sum_t W[t] @ x_aug[:, p + off(t)]     (+ bias via ones row)
        # Accumulator seeded by the first dot; plain dot chain (MRB-friendly).
        acc = jnp.dot(w_ref[0], x_ref[:, 0:span],
                      preferred_element_type=jnp.float32)
        for t in range(1, KH * KW):
            off = (t // KW) * W + (t % KW)
            acc = acc + jnp.dot(w_ref[t], x_ref[:, off:off + span],
                                preferred_element_type=jnp.float32)

        # Single finalize: gather the OH valid strips into one compact
        # (Cout, OH*OW) register tile, one add, one cast, one store.
        compact = jnp.concatenate(
            [acc[:, oh * W:oh * W + OW] for oh in range(OH)], axis=1)
        o_ref[...] = (compact + other_ref[...]).astype(o_ref.dtype)

    return kernel


@jax.jit
def conv2d_add(x, weight, bias, other):
    """x: (1, Cin, H, W) f32, weight: (Cout, Cin, KH, KW), bias: (Cout,),
    other: (1, Cout, OH, OW).  Returns conv(x) + bias + other, NCHW."""
    N, Cin, H, W = x.shape
    Cout, _, KH, KW = weight.shape
    OH, OW = H - KH + 1, W - KW + 1
    assert N == 1  # module spec uses batch 1
    # TODO(synk): for N > 1 add a leading ("parallel",) grid axis over N and
    #             flatten batch into the output lane axis (Cout, N*OH*OW) so
    #             stores become unmasked full-width vst (v7x 2nd TC ~2x).

    # Activation-side reshapes are contiguous (free).  Bias fold: ones row on
    # x, bias column on tap 0 of the (tiny, 1.4 KB) tap-major weight.
    x_aug = jnp.concatenate(
        [x.reshape(Cin, H * W), jnp.ones((1, H * W), x.dtype)], axis=0)
    w_taps = jnp.transpose(weight, (2, 3, 0, 1)).reshape(KH * KW, Cout, Cin)
    extra_col = jnp.zeros((KH * KW, Cout, 1), weight.dtype).at[0, :, 0].set(bias)
    w_aug = jnp.concatenate([w_taps, extra_col], axis=2)   # (KH*KW, Cout, Cin+1)
    other2d = other.reshape(Cout, OH * OW)                  # (8, 81), no transpose

    span = (OH - 1) * W + OW
    flops = 2 * Cout * (Cin + 1) * span * KH * KW
    bytes_accessed = 4 * ((Cin + 1) * H * W + KH * KW * Cout * (Cin + 1)
                          + 2 * Cout * OH * OW)

    out2d = pl.pallas_call(
        _make_conv_add_kernel(H, W, OH, OW, KH, KW),
        out_shape=jax.ShapeDtypeStruct((Cout, OH * OW), x.dtype),
        in_specs=[
            pl.BlockSpec(memory_space=pltpu.VMEM),   # x_aug
            pl.BlockSpec(memory_space=pltpu.VMEM),   # w_aug
            pl.BlockSpec(memory_space=pltpu.VMEM),   # other2d
        ],
        out_specs=pl.BlockSpec(memory_space=pltpu.VMEM),
        input_output_aliases={2: 0},                 # accumulate into `other`
        cost_estimate=pl.CostEstimate(flops=flops, transcendentals=0,
                                      bytes_accessed=bytes_accessed),
    )(x_aug, w_aug, other2d)

    return out2d.reshape(N, Cout, OH, OW)            # free reshape back to NCHW


def reference(x, weight, bias, other):
    """Pure-JAX reference for correctness check."""
    v1 = jax.lax.conv_general_dilated(
        x, weight, window_strides=(1, 1), padding="VALID",
        dimension_numbers=("NCHW", "OIHW", "NCHW"))
    v1 = v1 + bias.reshape(1, -1, 1, 1)
    return v1 + other


if __name__ == "__main__":
    key = jax.random.PRNGKey(0)
    k_x, k_w, k_b, k_o = jax.random.split(key, 4)

    N, Cin, H, W = 1, 10, 10, 10
    Cout, KH, KW = 8, 2, 2
    OH, OW = H - KH + 1, W - KW + 1

    x1 = jax.random.normal(k_x, (N, Cin, H, W), dtype=jnp.float32)

    # Deterministic parameter init (PyTorch-style uniform bound).
    fan_in = Cin * KH * KW
    bound = 1.0 / (fan_in ** 0.5)
    weight = jax.random.uniform(k_w, (Cout, Cin, KH, KW), jnp.float32, -bound, bound)
    bias = jax.random.uniform(k_b, (Cout,), jnp.float32, -bound, bound)

    # `other` defaults to torch.randn(v1.shape) in the module; supplied
    # explicitly here so the check is deterministic.  (`padding2` is dead code.)
    other = jax.random.normal(k_o, (N, Cout, OH, OW), dtype=jnp.float32)

    out = jax.block_until_ready(conv2d_add(x1, weight, bias, other))

    ref = reference(x1, weight, bias, other)
    assert out.shape == (N, Cout, OH, OW)
    assert jnp.allclose(out, ref, atol=1e-5, rtol=1e-5)

    print("KERNEL_OK")
</pallas_src>

<mosaic_0001>
module attributes {stable_mosaic.version = 11 : i64} {
  func.func @kernel(%arg0: memref<11x100xf32, #tpu.memory_space<vmem>>, %arg1: memref<4x8x11xf32, #tpu.memory_space<vmem>>, %arg2: memref<8x81xf32, #tpu.memory_space<vmem>>, %arg3: memref<8x81xf32, #tpu.memory_space<vmem>>) attributes {dimension_semantics = [], scalar_prefetch = 0 : i64, scratch_operands = 0 : i64, tpu.core_type = #tpu.core_type<tc>} {
    %c0 = arith.constant 0 : index
    %c0_0 = arith.constant 0 : index
    %c0_1 = arith.constant 0 : index
    %0 = vector.load %arg1[%c0, %c0_0, %c0_1] : memref<4x8x11xf32, #tpu.memory_space<vmem>>, vector<1x8x11xf32>
    %1 = vector.shape_cast %0 : vector<1x8x11xf32> to vector<8x11xf32>
    %c0_2 = arith.constant 0 : index
    %c0_3 = arith.constant 0 : index
    %2 = vector.load %arg0[%c0_2, %c0_3] : memref<11x100xf32, #tpu.memory_space<vmem>>, vector<11x89xf32>
    %cst = arith.constant dense<0.000000e+00> : vector<8x89xf32>
    %3 = tpu.matmul %1, %2, %cst {dimension_numbers = #tpu.dot_dimension_numbers<[1], [0], [0], [1], [0, 0, 1, 1], [], []>} : vector<8x11xf32>, vector<11x89xf32>, vector<8x89xf32> -> vector<8x89xf32>
    %c1 = arith.constant 1 : index
    %c0_4 = arith.constant 0 : index
    %c0_5 = arith.constant 0 : index
    %4 = vector.load %arg1[%c1, %c0_4, %c0_5] : memref<4x8x11xf32, #tpu.memory_space<vmem>>, vector<1x8x11xf32>
    %5 = vector.shape_cast %4 : vector<1x8x11xf32> to vector<8x11xf32>
    %c0_6 = arith.constant 0 : index
    %c1_7 = arith.constant 1 : index
    %6 = vector.load %arg0[%c0_6, %c1_7] : memref<11x100xf32, #tpu.memory_space<vmem>>, vector<11x89xf32>
    %cst_8 = arith.constant dense<0.000000e+00> : vector<8x89xf32>
    %7 = tpu.matmul %5, %6, %cst_8 {dimension_numbers = #tpu.dot_dimension_numbers<[1], [0], [0], [1], [0, 0, 1, 1], [], []>} : vector<8x11xf32>, vector<11x89xf32>, vector<8x89xf32> -> vector<8x89xf32>
    %8 = arith.addf %3, %7 : vector<8x89xf32>
    %c2 = arith.constant 2 : index
    %c0_9 = arith.constant 0 : index
    %c0_10 = arith.constant 0 : index
    %9 = vector.load %arg1[%c2, %c0_9, %c0_10] : memref<4x8x11xf32, #tpu.memory_space<vmem>>, vector<1x8x11xf32>
    %10 = vector.shape_cast %9 : vector<1x8x11xf32> to vector<8x11xf32>
    %c0_11 = arith.constant 0 : index
    %c10 = arith.constant 10 : index
    %11 = vector.load %arg0[%c0_11, %c10] : memref<11x100xf32, #tpu.memory_space<vmem>>, vector<11x89xf32>
    %cst_12 = arith.constant dense<0.000000e+00> : vector<8x89xf32>
    %12 = tpu.matmul %10, %11, %cst_12 {dimension_numbers = #tpu.dot_dimension_numbers<[1], [0], [0], [1], [0, 0, 1, 1], [], []>} : vector<8x11xf32>, vector<11x89xf32>, vector<8x89xf32> -> vector<8x89xf32>
    %13 = arith.addf %8, %12 : vector<8x89xf32>
    %c3 = arith.constant 3 : index
    %c0_13 = arith.constant 0 : index
    %c0_14 = arith.constant 0 : index
    %14 = vector.load %arg1[%c3, %c0_13, %c0_14] : memref<4x8x11xf32, #tpu.memory_space<vmem>>, vector<1x8x11xf32>
    %15 = vector.shape_cast %14 : vector<1x8x11xf32> to vector<8x11xf32>
    %c0_15 = arith.constant 0 : index
    %c11 = arith.constant 11 : index
    %16 = vector.load %arg0[%c0_15, %c11] : memref<11x100xf32, #tpu.memory_space<vmem>>, vector<11x89xf32>
    %cst_16 = arith.constant dense<0.000000e+00> : vector<8x89xf32>
    %17 = tpu.matmul %15, %16, %cst_16 {dimension_numbers = #tpu.dot_dimension_numbers<[1], [0], [0], [1], [0, 0, 1, 1], [], []>} : vector<8x11xf32>, vector<11x89xf32>, vector<8x89xf32> -> vector<8x89xf32>
    %18 = arith.addf %13, %17 : vector<8x89xf32>
    %19 = vector.extract_strided_slice %18 {offsets = [0, 0], sizes = [8, 9], strides = [1, 1]} : vector<8x89xf32> to vector<8x9xf32>
    %20 = vector.extract_strided_slice %18 {offsets = [0, 10], sizes = [8, 9], strides = [1, 1]} : vector<8x89xf32> to vector<8x9xf32>
    %21 = vector.extract_strided_slice %18 {offsets = [0, 20], sizes = [8, 9], strides = [1, 1]} : vector<8x89xf32> to vector<8x9xf32>
    %22 = vector.extract_strided_slice %18 {offsets = [0, 30], sizes = [8, 9], strides = [1, 1]} : vector<8x89xf32> to vector<8x9xf32>
    %23 = vector.extract_strided_slice %18 {offsets = [0, 40], sizes = [8, 9], strides = [1, 1]} : vector<8x89xf32> to vector<8x9xf32>
    %24 = vector.extract_strided_slice %18 {offsets = [0, 50], sizes = [8, 9], strides = [1, 1]} : vector<8x89xf32> to vector<8x9xf32>
    %25 = vector.extract_strided_slice %18 {offsets = [0, 60], sizes = [8, 9], strides = [1, 1]} : vector<8x89xf32> to vector<8x9xf32>
    %26 = vector.extract_strided_slice %18 {offsets = [0, 70], sizes = [8, 9], strides = [1, 1]} : vector<8x89xf32> to vector<8x9xf32>
    %27 = vector.extract_strided_slice %18 {offsets = [0, 80], sizes = [8, 9], strides = [1, 1]} : vector<8x89xf32> to vector<8x9xf32>
    %28 = tpu.concatenate %19, %20, %21, %22, %23, %24, %25, %26, %27 in 1 : vector<8x9xf32>, vector<8x9xf32>, vector<8x9xf32>, vector<8x9xf32>, vector<8x9xf32>, vector<8x9xf32>, vector<8x9xf32>, vector<8x9xf32>, vector<8x9xf32> -> vector<8x81xf32>
    %c0_17 = arith.constant 0 : index
    %c0_18 = arith.constant 0 : index
    %29 = vector.load %arg2[%c0_17, %c0_18] : memref<8x81xf32, #tpu.memory_space<vmem>>, vector<8x81xf32>
    %30 = arith.addf %28, %29 : vector<8x81xf32>
    %c0_19 = arith.constant 0 : index
    %c0_20 = arith.constant 0 : index
    %31 = vector.load %arg3[%c0_19, %c0_20] : memref<8x81xf32, #tpu.memory_space<vmem>>, vector<8x81xf32>
    tpu.vector_store %arg3[%c0_19, %c0_20], %30 {strides = array<i32>} : memref<8x81xf32, #tpu.memory_space<vmem>>, vector<8x81xf32>,
    return
  }
}

</mosaic_0001>

<bundles_post_ra>
// kernel: conv2d_add.1
= control target key start
LH: loop header
LB: loop body
LE: loop exit
PB: predicated region body
PF: predicated region fallthrough
CT: control target
= control target key end

     0   :  { %v494_v2 = vmov 0.0|0.0   ;;  %vm495_vm0 = vmmov 0   ;;  %v496_v5 = vmov 0.0   ;;  %s497_s16 = smov 127   ;;  %s498_s17 = smov 117   ;;  %vm30_vm1 = vcmask 1042432   ;;  %s574_s0 = inlined_call_operand.vmem [shape: f32[11,100], index: 0, kind: input, shape index: {}]   ;;  %s575_s1 = inlined_call_operand.vmem [shape: f32[4,8,11], index: 1, kind: input, shape index: {}]   ;;  %s576_s2 = inlined_call_operand.vmem [shape: f32[8,81], index: 2, kind: input, shape index: {}, may-alias: {2,3}]   ;;  %s577_s3 = inlined_call_operand.vmem [shape: f32[8,81], index: 3, kind: output, shape index: {}, may-alias: {2,3}]  }
   0x1   :  { %v15_v0 = vld [vmem:[%s574_s0] sm:$0xff]  ;;  %v16_v1 = vld [vmem:[%s574_s0 + $0x8] sm:$0x7]  ;;  %444 = vmatprep.subr.bf16.mxu1 %v494_v2  ;;  %452 = vmatprep.subr.bf16.mxu0 %v494_v2  ;;  %s499_s18 = smov 118   ;;  %vm500_vm2 = vmmov 1   ;;  %vm26_vm4 = vcmask 89088  }
   0x2   :  { %v479_v3 = vpack.i.bf16 %v16_v1, %v15_v0  ;;  %v449_v4 = vpack.c.bf16 %v16_v1, %v15_v0  ;;  %420 = vmatprep.mubr.msk.f32.mxu1 %vm495_vm0, %v496_v5  ;;  %434 = vmatprep.mubr.msk.f32.mxu0 %vm495_vm0, %v496_v5  ;;  %vm537_vm3 = vmpackc.low %vm30_vm1, %vm500_vm2  ;;  %v393_v17 = vld [vmem:[%s575_s1 + $0x8] sm:$0xff]  ;;  %v398_v20 = vld [vmem:[%s575_s1 + $0x10] sm:$0xff]  ;;  %s501_s26 = smov 126   ;;  %s502_s27 = smov 124   ;;  %vm369_vm5 = vcmask 72704   ;;  %vm371_vm6 = vcmask 146432  }
   0x3   :  { %v14_v21 = vld [vmem:[%s575_s1] sm:$0xff]  ;;  %v401_v22 = vld [vmem:[%s575_s1 + $0x18] sm:$0xff]  ;;  %s503_s28 = smov 125   ;;  %s504_s29 = smov 122   ;;  %vm373_vm7 = vcmask 220160   ;;  %vm375_vm8 = vcmask 293888  }
   0x4   :  { %480 = vrot.lane.b32.xlu0 %v479_v3, %s497_s16  ;;  %490 = vrot.lane.b32.xlu1 %v479_v3, %s498_s17  ;;  %s505_s30 = smov 123   ;;  %s506_s1 = smov 120   ;;  %vm377_vm9 = vcmask 367616   ;;  %vm379_vm10 = vcmask 441344   ;;  %vm381_vm11 = vcmask 515072   ;;  %vm383_vm12 = vcmask 588800  }
   0x5   :  { %s507_s4 = smov 121   ;;  %v385_v41 = vld [vmem:[%s576_s2] sm:$0xff]  ;;  %vm387_vm13 = vcmask 662528  }
   0x8   :  { %485 = vrot.lane.b32.xlu0 %v479_v3, %s499_s18 }
  0x76   :  { %v481_v6 = vpop.permute.xlu0 %480  ;;  %v491_v10 = vpop.permute.xlu1 %490 }
  0x77   :  { %v483_v7 = vunpack.i.h.bf16 %v481_v6  ;;  %v482_v8 = vunpack.i.l.bf16 %v481_v6  ;;  %v493_v15 = vunpack.i.h.bf16 %v491_v10  ;;  %v492_v16 = vunpack.i.l.bf16 %v491_v10 }
  0x79   :  { %v445_v11 = vpack.c.bf16 %v483_v7, %v482_v8  ;;  %v457_v19 = vpack.c.bf16 %v493_v15, %v492_v16 }
  0x7a   :  { %v486_v12 = vpop.permute.xlu0 %485 }
  0x7b   :  { %v488_v13 = vunpack.i.h.bf16 %v486_v12  ;;  %v487_v14 = vunpack.i.l.bf16 %v486_v12  ;;  %447 = vmatpush3.bf16.msk.msra.mxu1 %vm537_vm3, %v445_v11 }
  0x7c   :  { %448 = vmatprep.subr.bf16.mxu1 %v494_v2 }
  0x7d   :  { %v453_v18 = vpack.c.bf16 %v488_v13, %v487_v14 }
  0x7e   :  { %421 = vmatmul.mubr.msk.f32.vlgmr.msra.gmra.mrb[0].mxu1 %vm26_vm4, %v393_v17 }
  0x7f   :  { %455 = vmatpush3.bf16.msk.msra.mxu0 %vm537_vm3, %v453_v18  ;;  %451 = vmatpush3.bf16.msk.msra.mxu1 %vm537_vm3, %v449_v4 }
  0x80   :  { %456 = vmatprep.subr.bf16.mxu0 %v494_v2  ;;  %427 = vmatprep.mubr.msk.f32.mxu1 %vm495_vm0, %v496_v5 }
  0x82   :  { %435 = vmatmul.mubr.msk.f32.vlgmr.msra.gmra.mrb[0].mxu0 %vm26_vm4, %v398_v20 }
  0x83   :  { %459 = vmatpush3.bf16.msk.msra.mxu0 %vm537_vm3, %v457_v19  ;;  %441 = vmatprep.mubr.msk.f32.mxu0 %vm495_vm0, %v496_v5 }
  0x86   :  { %428 = vmatmul.mubr.msk.f32.vlgmr.msra.gmra.mrb[0].mxu1 %vm26_vm4, %v14_v21 }
  0x8a   :  { %442 = vmatmul.mubr.msk.f32.vlgmr.msra.gmra.mrb[0].mxu0 %vm26_vm4, %v401_v22 }
 0x159   :  { %v174_v23 = vpop.f32.mrb[0].mxu1 }
 0x15a   :  { %v429_v24 = vpop.f32.mrb[1].mxu1 }
 0x15d   :  { %v339_v25 = vpop.f32.mrb[0].mxu0 }
 0x15e   :  { %v460_v26 = vadd.f32 %v339_v25, %v174_v23  ;;  %v443_v27 = vpop.f32.mrb[1].mxu0 }
 0x160   :  { %348 = vrot.lane.b32.xlu0 %v460_v26, %s501_s26  ;;  %345 = vrot.lane.b32.xlu1 %v460_v26, %s497_s16 }
 0x164   :  { %354 = vrot.lane.b32.xlu0 %v460_v26, %s502_s27  ;;  %351 = vrot.lane.b32.xlu1 %v460_v26, %s503_s28 }
 0x168   :  { %360 = vrot.lane.b32.xlu0 %v460_v26, %s504_s29  ;;  %357 = vrot.lane.b32.xlu1 %v460_v26, %s505_s30 }
 0x16c   :  { %366 = vrot.lane.b32.xlu0 %v460_v26, %s506_s1  ;;  %363 = vrot.lane.b32.xlu1 %v460_v26, %s507_s4 }
 0x1d2   :  { %v349_v28 = vpop.permute.xlu0 %348  ;;  %v346_v29 = vpop.permute.xlu1 %345 }
 0x1d3   :  { %v370_v30 = vsel %vm369_vm5, %v460_v26, %v346_v29 }
 0x1d4   :  { %v372_v32 = vsel %vm371_vm6, %v370_v30, %v349_v28 }
 0x1d6   :  { %v355_v31 = vpop.permute.xlu0 %354  ;;  %v352_v33 = vpop.permute.xlu1 %351 }
 0x1d7   :  { %v374_v34 = vsel %vm373_vm7, %v372_v32, %v352_v33 }
 0x1d8   :  { %v376_v36 = vsel %vm375_vm8, %v374_v34, %v355_v31 }
 0x1da   :  { %v361_v35 = vpop.permute.xlu0 %360  ;;  %v358_v37 = vpop.permute.xlu1 %357 }
 0x1db   :  { %v378_v38 = vsel %vm377_vm9, %v376_v36, %v358_v37 }
 0x1dc   :  { %v380_v40 = vsel %vm379_vm10, %v378_v38, %v361_v35 }
 0x1de   :  { %v367_v39 = vpop.permute.xlu0 %366  ;;  %v364_v42 = vpop.permute.xlu1 %363 }
 0x1df   :  { %v382_v43 = vsel %vm381_vm11, %v380_v40, %v364_v42 }
 0x1e0   :  { %v384_v44 = vsel %vm383_vm12, %v382_v43, %v367_v39 }
 0x1e1   :  { %v386_v45 = vadd.f32 %v385_v41, %v384_v44 }
 0x1e3   :  { %388 = vst.msk [vmem:[%s577_s3] sm:$0xff] %vm387_vm13, %v386_v45 }

</bundles_post_ra>
